<compile_context>
chip_gen: v5e
topology: v5e:2x2
jax: 0.10.0
libtpu: 0.0.40
codegen_flags: <defaults>
</compile_context>

<pallas_src>
import jax
import jax.numpy as jnp
from jax.experimental import pallas as pl
from jax.experimental.pallas import tpu as pltpu


def _default_tiling():
    """Generation-aware tile targets + scoped-VMEM budget.

    v5e/v6e have 128 MiB VMEM per TensorCore -> larger L tiles (halo + per-step
    overhead drop to ~3-6%).  v7x has 64 MiB per TC -> cap the per-step
    footprint and keep the scoped-VMEM request <= ~48 MiB there.
    """
    big_vmem = False
    try:  # defensive: fall back to the v7x-safe setting on any failure
        cap = int(getattr(pltpu.get_tpu_info(), "vmem_capacity_bytes", 0) or 0)
        big_vmem = cap >= 100 * 1024 * 1024
    except Exception:
        big_vmem = False
    if big_vmem:                            # v5e / v6e (128 MiB VMEM per TC)
        return 128, 8192, 64 * 1024 * 1024
    return 256, 4096, 48 * 1024 * 1024      # v7x (64 MiB VMEM) or unknown


def depthwise_conv1d(x, weight, bias, padding, *,
                     tc_target=None, tl_target=None, vmem_limit_bytes=None):
    """Depthwise Conv1d matching PyTorch DepthWiseConv1d.forward.

    x:       (N, C, L)   input in PyTorch NCW layout (kernel works NCW-native)
    weight:  (C, 1, K)   nn.Conv1d(C, C, K, groups=C) weight
    bias:    (C,)        bias
    padding: (pad_left, pad_right) applied to the length dim (F.pad semantics)
    returns: (N, C, L + pad_left + pad_right - K + 1)

    Limitation (documented): the tiled halo scheme requires pad_left <= 128.
    """
    N, C, L = x.shape
    C_out, cin_per_group, K = weight.shape
    assert C_out == C and cin_per_group == 1, "pure depthwise: chan_out == chan_in"
    pad_left, pad_right = padding
    assert pad_left >= 0 and pad_right >= 0
    L_out = L + pad_left + pad_right - K + 1
    assert L_out >= 1

    auto_tc, auto_tl, auto_vmem = _default_tiling()
    tc_target = auto_tc if tc_target is None else tc_target
    tl_target = auto_tl if tl_target is None else tl_target
    vmem_limit_bytes = auto_vmem if vmem_limit_bytes is None else vmem_limit_bytes

    # ---- static tile selection --------------------------------------------
    # Channels -> sublanes, aligned to the dtype's sublane packing so sub-32-bit
    # dtypes don't force half-empty / repacked vregs.
    itemsize = jnp.dtype(x.dtype).itemsize
    pack = 8 * max(1, 4 // max(1, itemsize))          # f32:8, bf16:16, int8:32
    if C >= pack:
        tC = max(pack, (min(tc_target, C) // pack) * pack)
    else:
        tC = C                                         # tiny C: full-extent block
    nC = pl.cdiv(C, tC)

    # Length -> lanes (multiple of 128 -> lane-dense loads and stores).
    if L >= 128 and L_out >= 128:
        tL = min(tl_target, (L_out // 128) * 128, (L // 128) * 128)
        # Megacore/v7x: avoid a degenerate (1,1,1) grid leaving one TC idle.
        if N == 1 and nC == 1 and pl.cdiv(L_out, tL) == 1 and tL >= 256:
            tL = max(128, ((tL // 2) // 128) * 128)
        tXm, H = tL, 128                               # main-block / halo widths
    else:
        # TODO(synk): if production shapes ever have L_out < 128, pad L_out to a
        # multiple of 128 upstream to avoid masked partial stores.
        tL, tXm, H = L_out, L, L                       # tiny problem: one L tile

    W = tL + K - 1                 # input-window lanes per output tile
    lw = pad_left                  # lanes taken from the left halo block
    assert lw <= H, "pad_left > 128 is not supported by the tiled halo scheme"
    mmw = min(tXm, W - lw)         # lanes taken from the main block
    rw = W - lw - mmw              # lanes taken from the right halo block
    assert 0 <= rw <= H, "right reach larger than the halo block width"

    r = tXm // H                   # halo-granularity blocks per main block
    nHb = pl.cdiv(L, H)            # number of halo blocks covering x
    n_main = pl.cdiv(L, tXm)
    nL = pl.cdiv(L_out, tL)

    use_left = lw > 0
    use_right = rw > 0

    w_ck = weight[:, 0, :]                             # (C, K) channel-major taps
    b_c1 = bias.reshape(C, 1)                          # (C, 1)

    # ---- kernel body (all tiling constants are static via closure) ---------
    def kernel(*refs):
        idx = 0
        xl_ref = None
        if use_left:
            xl_ref = refs[idx]
            idx += 1
        xm_ref = refs[idx]
        idx += 1
        xr_ref = None
        if use_right:
            xr_ref = refs[idx]
            idx += 1
        w_ref, b_ref, o_ref = refs[idx], refs[idx + 1], refs[idx + 2]

        l = pl.program_id(2)

        # Assemble the window [left-halo | main | right-halo] along lanes.
        pieces = []
        if use_left:
            pieces.append(xl_ref[0, :, H - lw:])       # (tC, lw)
        pieces.append(xm_ref[0, :, :mmw])              # (tC, mmw)
        if use_right:
            pieces.append(xr_ref[0, :, :rw])           # (tC, rw)
        window = pieces[0] if len(pieces) == 1 else jnp.concatenate(pieces, axis=-1)
        window = window.astype(jnp.float32)            # (tC, W)

        w_f32 = w_ref[...].astype(jnp.float32)         # (tC, K)
        b_f32 = b_ref[...].astype(jnp.float32)         # (tC, 1)

        def mac_and_store(win):
            # K-tap depthwise MAC, statically unrolled, f32 accumulation.
            # TODO(synk): v7x-only micro-opt — move the per-tap lane shifts to
            # the XLU (pltpu.roll) and/or strip-mine acc to cut VMEM round
            # trips; needs bundle-level verification, kept simple (HBM-bound
            # on v5e/v6e either way).
            acc = win[:, 0:tL] * w_f32[:, 0:1]
            for k in range(1, K):
                acc = acc + win[:, k:k + tL] * w_f32[:, k:k + 1]
            o_ref[0, :, :] = (acc + b_f32).astype(o_ref.dtype)

        # Fused F.pad: any window lane whose global (unpadded) index falls
        # outside [0, L) is an implicit zero.  This also neutralizes
        # clamped/OOB halo blocks and ragged-tile garbage lanes.  Only boundary
        # tiles can contain such lanes, so interior tiles skip the mask.
        g_start = l * tL - pad_left
        needs_mask = jnp.logical_or(g_start < 0, g_start + W > L)

        @pl.when(needs_mask)
        def _():
            g = g_start + jax.lax.broadcasted_iota(jnp.int32, (1, W), 1)
            mac_and_store(jnp.where((g >= 0) & (g < L), window, 0.0))

        @pl.when(jnp.logical_not(needs_mask))
        def _():
            mac_and_store(window)

    # ---- block specs --------------------------------------------------------
    def xmain_map(n, c, l):
        return (n, c, jnp.clip(l, 0, n_main - 1))

    def left_map(n, c, l):
        return (n, c, jnp.clip(l * r - 1, 0, nHb - 1))

    def right_map(n, c, l):
        return (n, c, jnp.clip((l + 1) * r, 0, nHb - 1))

    def wb_map(n, c, l):
        return (c, 0)

    def out_map(n, c, l):
        return (n, c, l)

    in_specs = []
    inputs = []
    if use_left:
        in_specs.append(pl.BlockSpec((1, tC, H), left_map))
        inputs.append(x)
    in_specs.append(pl.BlockSpec((1, tC, tXm), xmain_map))
    inputs.append(x)
    if use_right:
        in_specs.append(pl.BlockSpec((1, tC, H), right_map))
        inputs.append(x)
    in_specs.append(pl.BlockSpec((tC, K), wb_map))
    in_specs.append(pl.BlockSpec((tC, 1), wb_map))
    inputs += [w_ck, b_c1]

    # Grid order requirement: l innermost so the weight/bias blocks (index
    # depends only on c) are re-DMA'd only when the channel tile changes.
    return pl.pallas_call(
        kernel,
        out_shape=jax.ShapeDtypeStruct((N, C, L_out), x.dtype),
        grid_spec=pltpu.PrefetchScalarGridSpec(
            num_scalar_prefetch=0,
            grid=(N, nC, nL),
            in_specs=in_specs,
            out_specs=pl.BlockSpec((1, tC, tL), out_map),
        ),
        compiler_params=pltpu.CompilerParams(
            dimension_semantics=("parallel", "parallel", "parallel"),
            vmem_limit_bytes=vmem_limit_bytes,
        ),
    )(*inputs)


def _reference_depthwise_conv1d(x_ncw, weight, bias, padding):
    """Pure-JAX reference mirroring F.pad + Conv1d(groups=C)."""
    pad_left, pad_right = padding
    x = jnp.pad(x_ncw, ((0, 0), (0, 0), (pad_left, pad_right)))
    K = weight.shape[-1]
    L_out = x.shape[-1] - K + 1
    out = jnp.zeros(x.shape[:2] + (L_out,), dtype=jnp.float32)
    for k in range(K):
        out = out + x[:, :, k:k + L_out].astype(jnp.float32) * \
            weight[:, 0, k].astype(jnp.float32)[None, :, None]
    out = out + bias.astype(jnp.float32)[None, :, None]
    return out.astype(x_ncw.dtype)


if __name__ == "__main__":
    key = jax.random.PRNGKey(0)

    def run_case(case_key, N, C, L, K, padding, **tiles):
        kx, kw, kb = jax.random.split(case_key, 3)
        x = jax.random.normal(kx, (N, C, L), dtype=jnp.float32)
        w = jax.random.normal(kw, (C, 1, K), dtype=jnp.float32) * 0.1
        b = jax.random.normal(kb, (C,), dtype=jnp.float32) * 0.1
        out = jax.block_until_ready(depthwise_conv1d(x, w, b, padding, **tiles))
        ref = _reference_depthwise_conv1d(x, w, b, padding)
        L_out = L + padding[0] + padding[1] - K + 1
        assert out.shape == (N, C, L_out)
        assert jnp.allclose(out, ref, atol=1e-4, rtol=1e-4), "mismatch vs reference"

    k1, k2, k3 = jax.random.split(key, 3)

    # Small config matching the module's typical causal use (single-tile path,
    # auto generation-aware tile defaults).
    run_case(k1, N=2, C=4, L=16, K=3, padding=(2, 0))
    # Tiled path: causal pad (left halo only), ragged C and L tiles, interior
    # tiles take the unmasked fast path, boundary/ragged tiles take the mask.
    run_case(k2, N=2, C=40, L=640, K=5, padding=(4, 0), tc_target=16, tl_target=256)
    # Tiled path with a right halo ("same"-style symmetric padding).
    run_case(k3, N=1, C=24, L=512, K=5, padding=(2, 2), tc_target=8, tl_target=128)

    print("KERNEL_OK")
</pallas_src>

<mosaic_0001>
module attributes {stable_mosaic.version = 11 : i64} {
  func.func @kernel(%arg0: i32, %arg1: i32, %arg2: i32, %arg3: memref<1x4x16xf32, #tpu.memory_space<vmem>>, %arg4: memref<1x4x16xf32, #tpu.memory_space<vmem>>, %arg5: memref<4x3xf32, #tpu.memory_space<vmem>>, %arg6: memref<4x1xf32, #tpu.memory_space<vmem>>, %arg7: memref<1x4x16xf32, #tpu.memory_space<vmem>>) attributes {dimension_semantics = [#tpu.dimension_semantics<parallel>, #tpu.dimension_semantics<parallel>, #tpu.dimension_semantics<parallel>], iteration_bounds = array<i64: 2, 1, 1>, scalar_prefetch = 0 : i64, scratch_operands = 0 : i64, tpu.core_type = #tpu.core_type<tc>, window_params = [{transform_indices = @transform_0, window_bounds = array<i64: 1, 4, 16>}, {transform_indices = @transform_1, window_bounds = array<i64: 1, 4, 16>}, {transform_indices = @transform_2, window_bounds = array<i64: 4, 3>}, {transform_indices = @transform_3, window_bounds = array<i64: 4, 1>}, {transform_indices = @transform_4, window_bounds = array<i64: 1, 4, 16>}]} {
    %c0 = arith.constant 0 : index
    %c0_0 = arith.constant 0 : index
    %c14 = arith.constant 14 : index
    %0 = vector.load %arg3[%c0, %c0_0, %c14] : memref<1x4x16xf32, #tpu.memory_space<vmem>>, vector<1x4x2xf32>
    %1 = vector.shape_cast %0 : vector<1x4x2xf32> to vector<4x2xf32>
    %c0_1 = arith.constant 0 : index
    %c0_2 = arith.constant 0 : index
    %c0_3 = arith.constant 0 : index
    %2 = vector.load %arg4[%c0_1, %c0_2, %c0_3] : memref<1x4x16xf32, #tpu.memory_space<vmem>>, vector<1x4x16xf32>
    %3 = vector.shape_cast %2 : vector<1x4x16xf32> to vector<4x16xf32>
    %4 = tpu.concatenate %1, %3 in 1 : vector<4x2xf32>, vector<4x16xf32> -> vector<4x18xf32>
    %c0_4 = arith.constant 0 : index
    %c0_5 = arith.constant 0 : index
    %5 = vector.load %arg5[%c0_4, %c0_5] : memref<4x3xf32, #tpu.memory_space<vmem>>, vector<4x3xf32>
    %c0_6 = arith.constant 0 : index
    %c0_7 = arith.constant 0 : index
    %6 = vector.load %arg6[%c0_6, %c0_7] : memref<4x1xf32, #tpu.memory_space<vmem>>, vector<4x1xf32>
    %c16_i32 = arith.constant 16 : i32
    %7 = arith.muli %arg2, %c16_i32 : i32
    %c2_i32 = arith.constant 2 : i32
    %8 = arith.subi %7, %c2_i32 : i32
    %c0_i32 = arith.constant 0 : i32
    %9 = arith.cmpi slt, %8, %c0_i32 : i32
    %c18_i32 = arith.constant 18 : i32
    %10 = arith.addi %8, %c18_i32 : i32
    %c16_i32_8 = arith.constant 16 : i32
    %11 = arith.cmpi sgt, %10, %c16_i32_8 : i32
    %12 = arith.ori %9, %11 : i1
    %13 = arith.extui %12 : i1 to i32
    %c0_i32_9 = arith.constant 0 : i32
    %14 = arith.cmpi ne, %13, %c0_i32_9 : i32
    scf.if %14 {
      %18 = tpu.iota {dimensions = array<i32: 1>} : vector<1x18xi32>
      %19 = vector.broadcast %8 : i32 to vector<1x18xi32>
      %20 = arith.addi %19, %18 : vector<1x18xi32>
      %c0_i32_11 = arith.constant 0 : i32
      %21 = vector.broadcast %c0_i32_11 : i32 to vector<1x18xi32>
      %22 = arith.cmpi sge, %20, %21 : vector<1x18xi32>
      %c16_i32_12 = arith.constant 16 : i32
      %23 = vector.broadcast %c16_i32_12 : i32 to vector<1x18xi32>
      %24 = arith.cmpi slt, %20, %23 : vector<1x18xi32>
      %25 = arith.andi %22, %24 : vector<1x18xi1>
      %cst = arith.constant 0.000000e+00 : f32
      %26 = vector.shape_cast %25 : vector<1x18xi1> to vector<1x18xi1>
      %27 = vector.broadcast %26 : vector<1x18xi1> to vector<4x18xi1>
      %28 = vector.broadcast %cst : f32 to vector<4x18xf32>
      %29 = arith.select %27, %4, %28 : vector<4x18xi1>, vector<4x18xf32>
      %30 = vector.extract_strided_slice %29 {offsets = [0, 0], sizes = [4, 16], strides = [1, 1]} : vector<4x18xf32> to vector<4x16xf32>
      %31 = vector.extract_strided_slice %5 {offsets = [0, 0], sizes = [4, 1], strides = [1, 1]} : vector<4x3xf32> to vector<4x1xf32>
      %32 = vector.broadcast %31 : vector<4x1xf32> to vector<4x16xf32>
      %33 = arith.mulf %30, %32 : vector<4x16xf32>
      %34 = vector.extract_strided_slice %29 {offsets = [0, 1], sizes = [4, 16], strides = [1, 1]} : vector<4x18xf32> to vector<4x16xf32>
      %35 = vector.extract_strided_slice %5 {offsets = [0, 1], sizes = [4, 1], strides = [1, 1]} : vector<4x3xf32> to vector<4x1xf32>
      %36 = vector.broadcast %35 : vector<4x1xf32> to vector<4x16xf32>
      %37 = arith.mulf %34, %36 : vector<4x16xf32>
      %38 = arith.addf %33, %37 : vector<4x16xf32>
      %39 = vector.extract_strided_slice %29 {offsets = [0, 2], sizes = [4, 16], strides = [1, 1]} : vector<4x18xf32> to vector<4x16xf32>
      %40 = vector.extract_strided_slice %5 {offsets = [0, 2], sizes = [4, 1], strides = [1, 1]} : vector<4x3xf32> to vector<4x1xf32>
      %41 = vector.broadcast %40 : vector<4x1xf32> to vector<4x16xf32>
      %42 = arith.mulf %39, %41 : vector<4x16xf32>
      %43 = arith.addf %38, %42 : vector<4x16xf32>
      %44 = vector.broadcast %6 : vector<4x1xf32> to vector<4x16xf32>
      %45 = arith.addf %43, %44 : vector<4x16xf32>
      %c0_13 = arith.constant 0 : index
      %c0_14 = arith.constant 0 : index
      %c0_15 = arith.constant 0 : index
      %46 = vector.load %arg7[%c0_13, %c0_14, %c0_15] : memref<1x4x16xf32, #tpu.memory_space<vmem>>, vector<1x4x16xf32>
      %47 = vector.shape_cast %46 : vector<1x4x16xf32> to vector<4x16xf32>
      %48 = vector.shape_cast %45 : vector<4x16xf32> to vector<1x4x16xf32>
      tpu.vector_store %arg7[%c0_13, %c0_14, %c0_15], %48 {strides = array<i32>} : memref<1x4x16xf32, #tpu.memory_space<vmem>>, vector<1x4x16xf32>,
    } else {
    }
    %true = arith.constant true
    %15 = arith.xori %12, %true : i1
    %16 = arith.extui %15 : i1 to i32
    %c0_i32_10 = arith.constant 0 : i32
    %17 = arith.cmpi ne, %16, %c0_i32_10 : i32
    scf.if %17 {
      %18 = vector.extract_strided_slice %4 {offsets = [0, 0], sizes = [4, 16], strides = [1, 1]} : vector<4x18xf32> to vector<4x16xf32>
      %19 = vector.extract_strided_slice %5 {offsets = [0, 0], sizes = [4, 1], strides = [1, 1]} : vector<4x3xf32> to vector<4x1xf32>
      %20 = vector.broadcast %19 : vector<4x1xf32> to vector<4x16xf32>
      %21 = arith.mulf %18, %20 : vector<4x16xf32>
      %22 = vector.extract_strided_slice %4 {offsets = [0, 1], sizes = [4, 16], strides = [1, 1]} : vector<4x18xf32> to vector<4x16xf32>
      %23 = vector.extract_strided_slice %5 {offsets = [0, 1], sizes = [4, 1], strides = [1, 1]} : vector<4x3xf32> to vector<4x1xf32>
      %24 = vector.broadcast %23 : vector<4x1xf32> to vector<4x16xf32>
      %25 = arith.mulf %22, %24 : vector<4x16xf32>
      %26 = arith.addf %21, %25 : vector<4x16xf32>
      %27 = vector.extract_strided_slice %4 {offsets = [0, 2], sizes = [4, 16], strides = [1, 1]} : vector<4x18xf32> to vector<4x16xf32>
      %28 = vector.extract_strided_slice %5 {offsets = [0, 2], sizes = [4, 1], strides = [1, 1]} : vector<4x3xf32> to vector<4x1xf32>
      %29 = vector.broadcast %28 : vector<4x1xf32> to vector<4x16xf32>
      %30 = arith.mulf %27, %29 : vector<4x16xf32>
      %31 = arith.addf %26, %30 : vector<4x16xf32>
      %32 = vector.broadcast %6 : vector<4x1xf32> to vector<4x16xf32>
      %33 = arith.addf %31, %32 : vector<4x16xf32>
      %c0_11 = arith.constant 0 : index
      %c0_12 = arith.constant 0 : index
      %c0_13 = arith.constant 0 : index
      %34 = vector.load %arg7[%c0_11, %c0_12, %c0_13] : memref<1x4x16xf32, #tpu.memory_space<vmem>>, vector<1x4x16xf32>
      %35 = vector.shape_cast %34 : vector<1x4x16xf32> to vector<4x16xf32>
      %36 = vector.shape_cast %33 : vector<4x16xf32> to vector<1x4x16xf32>
      tpu.vector_store %arg7[%c0_11, %c0_12, %c0_13], %36 {strides = array<i32>} : memref<1x4x16xf32, #tpu.memory_space<vmem>>, vector<1x4x16xf32>,
    } else {
    }
    return
  }
  func.func @transform_0(%arg0: i32, %arg1: i32, %arg2: i32) -> (i32, i32, i32) {
    %c1_i32 = arith.constant 1 : i32
    %0 = arith.muli %arg2, %c1_i32 : i32
    %c1_i32_0 = arith.constant 1 : i32
    %1 = arith.subi %0, %c1_i32_0 : i32
    %c0_i32 = arith.constant 0 : i32
    %c0_i32_1 = arith.constant 0 : i32
    %2 = arith.maxsi %c0_i32, %1 : i32
    %3 = arith.minsi %c0_i32_1, %2 : i32
    %c0_i32_2 = arith.constant 0 : i32
    return %arg0, %arg1, %3 : i32, i32, i32
  }
  func.func @transform_1(%arg0: i32, %arg1: i32, %arg2: i32) -> (i32, i32, i32) {
    %c0_i32 = arith.constant 0 : i32
    %c0_i32_0 = arith.constant 0 : i32
    %0 = arith.maxsi %c0_i32, %arg2 : i32
    %1 = arith.minsi %c0_i32_0, %0 : i32
    %c0_i32_1 = arith.constant 0 : i32
    return %arg0, %arg1, %1 : i32, i32, i32
  }
  func.func @transform_2(%arg0: i32, %arg1: i32, %arg2: i32) -> (i32, i32) {
    %c0_i32 = arith.constant 0 : i32
    %c0_i32_0 = arith.constant 0 : i32
    return %arg1, %c0_i32 : i32, i32
  }
  func.func @transform_3(%arg0: i32, %arg1: i32, %arg2: i32) -> (i32, i32) {
    %c0_i32 = arith.constant 0 : i32
    %c0_i32_0 = arith.constant 0 : i32
    return %arg1, %c0_i32 : i32, i32
  }
  func.func @transform_4(%arg0: i32, %arg1: i32, %arg2: i32) -> (i32, i32, i32) {
    %c0_i32 = arith.constant 0 : i32
    return %arg0, %arg1, %arg2 : i32, i32, i32
  }
}

</mosaic_0001>

<bundles_post_ra>
// kernel: tpu_custom_call.1
= control target key start
LH: loop header
LB: loop body
LE: loop exit
PB: predicated region body
PF: predicated region fallthrough
CT: control target
= control target key end

     0   :  { %9 = vsyncpa [#allocation3], 0  ;;  %s1037_s0 = inlined_call_operand.hbm [shape: f32[2,4,16], index: 0, kind: input, shape index: {}]   ;;  %s1038_s1 = inlined_call_operand.hbm [shape: f32[2,4,16], index: 1, kind: input, shape index: {}]   ;;  %s1039_s2 = inlined_call_operand.vmem [shape: f32[4,3], index: 2, kind: input, shape index: {}]   ;;  %s1040_s3 = inlined_call_operand.vmem [shape: f32[4,1], index: 3, kind: input, shape index: {}]   ;;  %s1041_s4 = inlined_call_operand.hbm [shape: f32[2,4,16], index: 4, kind: output, shape index: {}]  }
   0x1   :  { %11 = vsyncpa [#allocation3 + $0x1], 0 }
   0x2   :  { %12 = vsyncpa [#allocation6], 0 }
   0x3   :  { %14 = vsyncpa [#allocation6 + $0x1], 0 }
   0x4   :  { %15 = vsyncpa [#allocation4], 0 }
   0x5   :  { %17 = vsyncpa [#allocation4 + $0x1], 0  ;;  %s898_s15 = smov 0   ;;  %s900_s16 = smov 0  }
   0x6   :  { %s902_s17 = smov 0   ;;  %s904_s18 = smov 0  }
   0x7   :  { %s906_s19 = smov 0   ;;  %s908_s20 = smov 0  }
   0x8 LB: > { %s621_s21 = sadd.s32 4294967295, %s864_s20   ;;  %s622_s22 = sadd.s32 4294967294, %s864_s20   ;;  %s864_s20 = sphi %s908_s20, %s23_s20   ;;  %s860_s19 = sphi %s906_s19, %s1053_s19   ;;  %s856_s18 = sphi %s904_s18, %s1052_s18   ;;  %s852_s17 = sphi %s902_s17, %s1051_s17   ;;  %s848_s16 = sphi %s900_s16, %s1050_s16   ;;  %s844_s15 = sphi %s898_s15, %s1049_s15  }
   0x9   : > { %s42_s23 = sadd.s32 1, %s860_s19  ;;  %s63_s24 = sadd.s32 1, %s852_s17 }
   0xa   : > { %p44_p0 = scmp.ge.s32.totalorder %s42_s23, 2  ;;  %p70_p1 = scmp.ne.s32.totalorder %s852_s17, %s848_s16 }
   0xb   : > { %p71_p2 = scmp.eq.s32.totalorder %s864_s20, 0  ;;  %p76_p3 = scmp.ne.s32.totalorder %s848_s16, %s844_s15 }
   0xc   : > { %s1055_s23 = smov (%p44_p0, %s42_s23), 0  ;;  %p77_p5 = scmp.eq.s32.totalorder %s621_s21, 0 }
   0xd   : > { %1043 = sst [smem:[#allocation11_spill]] %s1055_s23  ;;  %p939_p4 = por %p71_p2, %p70_p1 }
   0xe   : > { %s56_s26 = ssub.s32 %s860_s19, %s1055_s23  ;;  %p194_p6 = scmp.eq.s32.totalorder %s621_s21, 1 }
   0xf   : > { %p61_p7 = scmp.eq.s32.totalorder %s56_s26, 0  ;;  %p945_p8 = por %p77_p5, %p76_p3 }
  0x10   : > { %p949_p9 = por %p194_p6, %p70_p1  ;;  %p200_p10 = scmp.eq.s32.totalorder %s622_s22, 1 }
  0x11   : > { %s954_s29 = scalar_select %p61_p7, %s852_s17, %s63_s24  }
  0x12   : > { %p956_p11 = por %p200_p10, %p76_p3  ;;  %p626_p12 = scmp.ge.s32.totalorder %s864_s20, 2 }
  0x13   : > { %p656_p13 = scmp.lt.s32.totalorder %s864_s20, 2  ;;  %s234_s5 = sand.u32 1, %s852_s17  }
  0x14   : > { %s627_s6 = sshll.u32 %s234_s5, 2  ;;  %s628_s7 = sshll.u32 %s860_s19, 2 }
  0x15   : > { %s249_s10 = scalar_lea.hbm %s1037_s0, %s628_s7  ;;  %s238_s11 = scalar_lea.vmem [#allocation2], %s627_s6 }
  0x16   : > { %s253_s12 = sshll.u32 %s238_s11, 4  ;;  %s251_s13 = sshll.u32 %s249_s10, 4  ;;  %s254_s12 = int_to_ptr.vmem [resolvable:$true] %s253_s12  ;;  %s252_s13 = int_to_ptr.hbm [resolvable:$true] %s251_s13 }
  0x17   : > { %p646_p0 = pnand %p656_p13, %p939_p4  ;;  %p631_p1 = scmp.ge.s32.totalorder %s864_s20, 1 }
  0x18   : > { %p283_p2 = scmp.lt.s32.totalorder %s864_s20, 3  ;;  %s235_s14 = scalar_lea.sflag [#allocation3], %s234_s5 }
  0x19   : > { %648 = dma.hbm_to_vmem [thread:$0]  (!%p646_p0), %s252_s13, 64, %s254_s12, %s235_s14  }
  0x1a   : > { %p284_p3 = pnand %p631_p1, %p283_p2  ;;  %s274_s24 = scalar_lea.hbm %s1038_s1, %s628_s7 }
  0x1b   : > { %s264_s26 = scalar_lea.vmem [#allocation5], %s627_s6  ;;  %s276_s8 = sshll.u32 %s274_s24, 4  ;;  %s277_s8 = int_to_ptr.hbm [resolvable:$true] %s276_s8 }
  0x1c   : > { %s278_s23 = sshll.u32 %s264_s26, 4  ;;  %s261_s9 = scalar_lea.sflag [#allocation6], %s234_s5  ;;  %s279_s23 = int_to_ptr.vmem [resolvable:$true] %s278_s23 }
  0x1d   : > { %651 = dma.hbm_to_vmem [thread:$0]  (!%p646_p0), %s277_s8, 64, %s279_s23, %s261_s9  }
  0x1e   : > { %287 = sbr.rel (%p284_p3) target bundleno = 290 (0x122), region = 36  ;;  %s975_s25 = sand.u32 (!%p284_p3), 1, %s848_s16  }
  0x1f   : > { %s978_s10 = sshll.u32 (!%p284_p3), %s975_s25, 2  ;;  %s290_s11 = scalar_lea.sflag (!%p284_p3), [#allocation3], %s975_s25 }
  0x20   : > { %s293_s12 = scalar_lea.vmem (!%p284_p3), [#allocation2], %s978_s10 }
  0x23   : > { %831 = dma.done.wait (%p945_p8), %s290_s11, 64  }
  0x24   : > { %833 = vsyncadd (%p945_p8), %s290_s11, 4294967232  ;;  %s300_s23 = scalar_lea.sflag [#allocation6], %s975_s25  ;;  %s303_s5 = scalar_lea.vmem [#allocation5], %s978_s10 }
  0x25   : > { %835 = dma.done.wait (%p945_p8), %s300_s23, 64  }
  0x26   : > { %837 = vsyncadd (%p945_p8), %s300_s23, 4294967232  ;;  %v866_v0 = vmov 1   ;;  %v867_v1 = vmov 0   ;;  %v359_v2 = vld [vmem:[%s293_s12] sm:$0xf]  ;;  %s868_s13 = smov 114   ;;  %v382_v7 = vlaneseq }
  0x27   : > { %713 = vset.pattern.permute.xlu1 %v866_v0  ;;  %715 = vset.pattern.permute.xlu2 %v867_v1  ;;  %v371_v3 = vld [vmem:[%s1039_s2] sm:$0xf]  ;;  %v360_v4 = vld [vmem:[%s303_s5] sm:$0xf]  ;;  %s869_s14 = smov 2   ;;  %v870_v5 = vmov 2  }
  0x28   : > { %717 = vset.pattern.permute.xlu0 %v867_v1  ;;  %399 = vperm.xlu1 %713, %v371_v3   ;;  %v372_v6 = vld [vmem:[%s1040_s3] sm:$0xf]  ;;  %v383_v8 = vand.u32 127, %v382_v7  ;;  %vm369_vm2 = vcmask 15360   ;;  %s871_s22 = smov 126   ;;  %s872_s24 = smov 127  }
  0x29   : > { %362 = vrot.lane.b32.xlu0 %v359_v2, %s868_s13  ;;  %394 = vperm.xlu2 %715, %v371_v3   ;;  %s636_s26 = sshll.u32 %s856_s18, 2  ;;  %s341_s12 = scalar_lea.vmem [#allocation7], %s978_s10  ;;  %vm424_vm4 = vcmask 125952  }
  0x2a   : > { %v385_v11 = vadd.s32 4294967294, %v383_v8  ;;  %s476_s11 = scalar_lea.hbm %s1041_s4, %s636_s26  ;;  %s478_s23 = sshll.u32 %s341_s12, 4  ;;  %s479_s23 = int_to_ptr.vmem [resolvable:$true] %s478_s23 }
  0x2b   : > { %s480_s5 = sshll.u32 %s476_s11, 4  ;;  %s464_s18 = scalar_lea.sflag [#allocation4], %s975_s25  ;;  %s481_s5 = int_to_ptr.hbm [resolvable:$true] %s480_s5 }
  0x2c   : > { %vm386_vm0 = vcmp.ge.s32.totalorder %v385_v11, 0  ;;  %vm387_vm1 = vcmp.lt.s32.totalorder %v385_v11, 16  ;;  %s792_s6 = sshra.s32 %s481_s5, 4  ;;  %s798_s10 = scalar_lea.hbm %s1041_s4, 8  ;;  %s793_s6 = int_to_ptr.hbm [resolvable:$true] %s792_s6 }
  0x2d   : > { %vm388_vm3 = vmand %vm386_vm0, %vm387_vm1  ;;  %s794_s7 = scalar_lea.hbm %s793_s6, 4  ;;  %p799_p7 = scmp.lt.s32.totalorder %s793_s6, %s1041_s4 }
  0x2e   : > { %p795_p4 = scmp.ne.s32.totalorder %s793_s6, %s794_s7  ;;  %p800_p8 = scmp.lt.s32.totalorder %s798_s10, %s794_s7 }
  0x30   : > { %714 = vset.pattern.permute.xlu1 %v870_v5  ;;  %p796_p5 = pnand %p795_p4, %p949_p9  ;;  %p801_p10 = por %p800_p8, %p799_p7 }
  0x31   : > { %366 = vrot.lane.b32.xlu0 %v360_v4, %s869_s14  ;;  %409 = vperm.xlu1 %714, %v371_v3  }
  0x32   : > { %p797_p6 = pneg %p796_p5 }
  0x34   : > { %p802_p13 = pnand %p801_p10, %p797_p6 }
  0x39   : > { %716 = vset.pattern.permute.xlu1 %v867_v1 }
  0x3a   : > { %420 = vperm.xlu1 %716, %v372_v6  }
  0x83   : > { %v395_v18 = vpop.permute.xlu2 %394 }
  0x9a   : > { %v400_v10 = vpop.permute.xlu1 %399 }
  0x9b   : > { %v363_v9 = vpop.permute.xlu0 %362 }
  0xa3   : > { %v367_v12 = vpop.permute.xlu0 %366  ;;  %v410_v14 = vpop.permute.xlu1 %409 }
  0xa4   : > { %v370_v13 = vsel %vm369_vm2, %v363_v9, %v367_v12 }
  0xa5   : > { %v391_v15 = vsel %vm388_vm3, %v370_v13, 0.0 }
  0xa6   : > { %v412_v16 = vmul.f32 %v410_v14, %v391_v15  ;;  %v402_v17 = vmul.f32 %v400_v10, %v391_v15  ;;  %v397_v20 = vmul.f32 %v395_v18, %v391_v15 }
  0xa8   : > { %414 = vrot.lane.b32.xlu0 %v412_v16, %s871_s22  ;;  %404 = vrot.lane.b32.xlu2 %v402_v17, %s872_s24 }
  0xac   : > { %v421_v23 = vpop.permute.xlu1 %420 }
 0x102   : > { %v405_v19 = vpop.permute.xlu2 %404 }
 0x103   : > { %v407_v21 = vadd.f32 %v405_v19, %v397_v20 }
 0x11a   : > { %v415_v22 = vpop.permute.xlu0 %414 }
 0x11b   : > { %v417_v24 = vadd.f32 %v415_v22, %v407_v21 }
 0x11d   : > { %v423_v25 = vadd.f32 %v421_v23, %v417_v24 }
 0x11f   : > { %425 = vst.msk [vmem:[%s341_s12] sm:$0xf] %vm424_vm4, %v423_v25 }
 0x120   : > { %805 = shalt.err (!%p802_p13)
}
 0x121   : > { %643 = dma.vmem_to_hbm [thread:$0]  (%p949_p9), %s479_s23, 64, %s481_s5, %s464_s18  }
 0x122 PF: > { %s492_s25 = sand.u32 1, %s844_s15   ;;  %p653_p0 = pnand %p626_p12, %p956_p11 }
 0x123   : > { %s493_s22 = scalar_lea.sflag [#allocation4], %s492_s25 }
 0x124   : > { %p654_p1 = pneg %p653_p0 }
 0x126   : > { %839 = dma.done.wait (%p654_p1), %s493_s22, 64  }
 0x127   : > { %841 = vsyncadd (%p654_p1), %s493_s22, 4294967232  ;;  %s23_s20 = sadd.s32 1, %s864_s20   ;;  %s1048_s28 = sld [smem:[#allocation11_spill]] }
 0x128   : > { %p20_p2 = scmp.ge.s32.totalorder %s23_s20, 4   ;;  %s1049_s15 = smov %s848_s16 }
 0x129   : > { %s1050_s16 = smov %s852_s17  ;;  %s1051_s17 = smov %s954_s29 }
 0x12a   : > { %s1052_s18 = smov %s860_s19  ;;  %22 = sbr.rel (!%p20_p2) target bundleno = 8 (0x8), region = 108 }
 0x12d   : > { %s1053_s19 = smov %s1048_s28 }
 0x12f   :  { %499 = vsyncpa [#allocation3], 1 }
 0x130   :  { %501 = vsyncpa [#allocation3 + $0x1], 1 }
 0x131   :  { %502 = vsyncpa [#allocation6], 1 }
 0x132   :  { %504 = vsyncpa [#allocation6 + $0x1], 1 }
 0x133   :  { %505 = vsyncpa [#allocation4], 1 }
 0x134   :  { %507 = vsyncpa [#allocation4 + $0x1], 1 }

</bundles_post_ra>
